<compile_context>
chip_gen: v5e
topology: v5e:2x2
jax: 0.10.0
libtpu: 0.0.40
codegen_flags: <defaults>
</compile_context>

<pallas_src>
import math
import functools

import jax
import jax.numpy as jnp
from jax.experimental import pallas as pl
from jax.experimental.pallas import tpu as pltpu


LOG_STD_MIN = -20.0
LOG_STD_MAX = 2.0
_HALF_LOG_2PI = 0.5 * math.log(2.0 * math.pi)


def _policy_kernel(*refs, action_dim, deterministic):
    if deterministic:
        (obs_ref, w1_ref, b1_ref, w2_ref, b2_ref, w3_ref, b3_ref,
         out_ref) = refs
        eps_ref = None
    else:
        (obs_ref, w1_ref, b1_ref, w2_ref, b2_ref, w3_ref, b3_ref,
         eps_ref, out_ref) = refs

    # --- FullyConnectedNetwork: Linear -> ReLU -> Linear -> ReLU -> Linear ---
    # MXU operands in bf16, accumulate in f32, biases added in f32.
    x = obs_ref[...].astype(jnp.bfloat16)
    h1 = jnp.dot(x, w1_ref[...], preferred_element_type=jnp.float32) + b1_ref[...]
    h1 = jnp.maximum(h1, 0.0)
    h2 = jnp.dot(h1.astype(jnp.bfloat16), w2_ref[...],
                 preferred_element_type=jnp.float32) + b2_ref[...]
    h2 = jnp.maximum(h2, 0.0)
    out = jnp.dot(h2.astype(jnp.bfloat16), w3_ref[...],
                  preferred_element_type=jnp.float32) + b3_ref[...]

    # --- split into mean / log_std (multiplier & offset already folded into
    #     w3/b3 by the wrapper) ---
    mean = out[:, :action_dim]
    log_std = out[:, action_dim:]
    log_std = jnp.clip(log_std, LOG_STD_MIN, LOG_STD_MAX)
    std = jnp.exp(log_std)

    # --- ReparameterizedTanhGaussian forward ---
    if deterministic:
        pre_tanh = mean
        # z == 0 exactly: Normal log-prob at the mean.
        normal_lp = -log_std - _HALF_LOG_2PI
    else:
        eps = eps_ref[...]
        # rsample of Normal(mean, std): mean + std * eps
        pre_tanh = mean + std * eps
        # (pre_tanh - mean) / std == eps exactly -> no divide needed.
        normal_lp = -0.5 * eps * eps - log_std - _HALF_LOG_2PI

    action = jnp.tanh(pre_tanh)

    # TanhTransform.log_abs_det_jacobian(x, y) = 2 * (log 2 - x - softplus(-2x))
    neg2x = -2.0 * pre_tanh
    softplus = jnp.maximum(neg2x, 0.0) + jnp.log1p(jnp.exp(-jnp.abs(neg2x)))
    log_det_jac = 2.0 * (math.log(2.0) - pre_tanh - softplus)

    lp = jnp.sum(normal_lp - log_det_jac, axis=-1, keepdims=True)

    # Packed output slab: [:, :A] = action, [:, A:] = log_prob.
    out_ref[:, :action_dim] = action.astype(out_ref.dtype)
    out_ref[:, action_dim:] = lp.astype(out_ref.dtype)


def _round_up(x, m):
    return ((x + m - 1) // m) * m


def tanh_gaussian_policy_forward(observations, params, eps=None,
                                 deterministic=False):
    """Pallas implementation of TanhGaussianPolicy.forward (repeat=None)."""
    B, obs_dim = observations.shape
    w1, b1, w2, b2 = params["w1"], params["b1"], params["w2"], params["b2"]
    w3, b3 = params["w3"], params["b3"]
    H1 = w1.shape[1]
    H2 = w2.shape[1]
    two_a = w3.shape[1]
    action_dim = two_a // 2

    # Fold log_std_multiplier / log_std_offset into the last layer (done once,
    # outside the kernel).
    mult = jnp.asarray(params["log_std_multiplier"], jnp.float32)
    off = jnp.asarray(params["log_std_offset"], jnp.float32)
    w3f = jnp.concatenate([w3[:, :action_dim], w3[:, action_dim:] * mult], axis=1)
    b3f = jnp.concatenate([b3[:, :action_dim], b3[:, action_dim:] * mult + off],
                          axis=1)

    # bf16 weights for the MXU; biases stay f32 (added post-matmul).
    w1b = w1.astype(jnp.bfloat16)
    w2b = w2.astype(jnp.bfloat16)
    w3b = w3f.astype(jnp.bfloat16)
    b1f = b1.astype(jnp.float32)
    b2f = b2.astype(jnp.float32)
    b3f = b3f.astype(jnp.float32)

    # Batch tiling: modest tile (<=256 rows), multiple of 8.
    TB = min(256, _round_up(B, 8))
    B_pad = _round_up(B, TB)
    grid = (B_pad // TB,)

    obs = observations.astype(jnp.float32)
    if B_pad != B:
        obs = jnp.pad(obs, ((0, B_pad - B), (0, 0)))

    # Block specs: batch-indexed for per-step data, constant for weights
    # (constant block index -> weights DMA'd once and stay VMEM-resident).
    batch_spec = lambda cols: pl.BlockSpec((TB, cols), lambda i: (i, 0))
    const_spec = lambda shape: pl.BlockSpec(shape, lambda i: (0, 0))

    in_specs = [
        batch_spec(obs_dim),        # observations
        const_spec((obs_dim, H1)),  # w1
        const_spec((1, H1)),        # b1
        const_spec((H1, H2)),       # w2
        const_spec((1, H2)),        # b2
        const_spec((H2, two_a)),    # w3 (folded)
        const_spec((1, two_a)),     # b3 (folded)
    ]
    args = [obs, w1b, b1f, w2b, b2f, w3b, b3f]

    if not deterministic:
        if eps is None:
            raise ValueError("eps must be provided when deterministic=False")
        eps_f = eps.astype(jnp.float32)
        if B_pad != B:
            eps_f = jnp.pad(eps_f, ((0, B_pad - B), (0, 0)))
        in_specs.append(batch_spec(action_dim))
        args.append(eps_f)

    out_cols = action_dim + 1  # action + packed log_prob column

    flops = 2 * B_pad * (obs_dim * H1 + H1 * H2 + H2 * two_a)
    transcendentals = 4 * B_pad * action_dim  # exp, tanh, exp, log1p per elem
    bytes_accessed = (obs.size * 4 + (eps.size * 4 if not deterministic else 0)
                      + (w1b.size + w2b.size + w3b.size) * 2
                      + (b1f.size + b2f.size + b3f.size) * 4
                      + B_pad * out_cols * 4)

    kernel = functools.partial(
        _policy_kernel, action_dim=action_dim, deterministic=deterministic)

    packed = pl.pallas_call(
        kernel,
        out_shape=jax.ShapeDtypeStruct((B_pad, out_cols), jnp.float32),
        grid_spec=pltpu.PrefetchScalarGridSpec(
            num_scalar_prefetch=0,
            grid=grid,
            in_specs=in_specs,
            out_specs=batch_spec(out_cols),
        ),
        compiler_params=pltpu.CompilerParams(
            dimension_semantics=("parallel",)),
        cost_estimate=pl.CostEstimate(
            flops=flops,
            transcendentals=transcendentals,
            bytes_accessed=bytes_accessed),
    )(*args)

    action = packed[:B, :action_dim]
    log_prob = packed[:B, action_dim]
    return action, log_prob


def init_params(key, obs_dim, action_dim, hidden_sizes=(32, 32),
                log_std_multiplier=1.0, log_std_offset=-1.0):
    """Deterministic init matching nn.Linear's default U(-1/sqrt(fan_in), ...)."""
    sizes = [obs_dim] + list(hidden_sizes) + [2 * action_dim]
    params = {}
    names = ["1", "2", "3"]
    for idx, (d_in, d_out) in enumerate(zip(sizes[:-1], sizes[1:])):
        key, kw, kb = jax.random.split(key, 3)
        bound = 1.0 / math.sqrt(d_in)
        params[f"w{names[idx]}"] = jax.random.uniform(
            kw, (d_in, d_out), jnp.float32, -bound, bound)
        params[f"b{names[idx]}"] = jax.random.uniform(
            kb, (1, d_out), jnp.float32, -bound, bound)
    params["log_std_multiplier"] = jnp.float32(log_std_multiplier)
    params["log_std_offset"] = jnp.float32(log_std_offset)
    return params


if __name__ == "__main__":
    key = jax.random.PRNGKey(0)
    B, obs_dim, action_dim = 8, 16, 8
    hidden = (32, 32)   # arch='32-32' (small stand-in for '256-256')

    k_params, k_obs, k_eps = jax.random.split(key, 3)
    params = init_params(k_params, obs_dim, action_dim, hidden)
    observations = jax.random.normal(k_obs, (B, obs_dim), jnp.float32)
    # TODO(synk): rsample noise is generated outside the kernel (jax.random)
    # rather than with the in-kernel PRNG, to keep the reparameterized
    # semantics exact: pre_tanh = mean + std * eps.
    eps = jax.random.normal(k_eps, (B, action_dim), jnp.float32)

    # Stochastic path.
    action, log_prob = tanh_gaussian_policy_forward(
        observations, params, eps, deterministic=False)
    jax.block_until_ready((action, log_prob))
    assert action.shape == (B, action_dim)
    assert log_prob.shape == (B,)
    assert bool(jnp.all(jnp.isfinite(action))) and bool(jnp.all(jnp.isfinite(log_prob)))

    # Deterministic path (eps not passed / not DMA'd).
    action_d, log_prob_d = tanh_gaussian_policy_forward(
        observations, params, deterministic=True)
    jax.block_until_ready((action_d, log_prob_d))
    assert action_d.shape == (B, action_dim)
    assert log_prob_d.shape == (B,)
    assert bool(jnp.all(jnp.isfinite(action_d))) and bool(jnp.all(jnp.isfinite(log_prob_d)))

    print("KERNEL_OK")
</pallas_src>

<mosaic_0001>
module attributes {stable_mosaic.version = 11 : i64} {
  func.func @_policy_kernel(%arg0: i32, %arg1: memref<8x16xf32, #tpu.memory_space<vmem>>, %arg2: memref<16x32xbf16, #tpu.memory_space<vmem>>, %arg3: memref<1x32xf32, #tpu.memory_space<vmem>>, %arg4: memref<32x32xbf16, #tpu.memory_space<vmem>>, %arg5: memref<1x32xf32, #tpu.memory_space<vmem>>, %arg6: memref<32x16xbf16, #tpu.memory_space<vmem>>, %arg7: memref<1x16xf32, #tpu.memory_space<vmem>>, %arg8: memref<8x8xf32, #tpu.memory_space<vmem>>, %arg9: memref<8x9xf32, #tpu.memory_space<vmem>>) attributes {dimension_semantics = [#tpu.dimension_semantics<parallel>], iteration_bounds = array<i64: 1>, scalar_prefetch = 0 : i64, scratch_operands = 0 : i64, tpu.core_type = #tpu.core_type<tc>, window_params = [{transform_indices = @transform_0, window_bounds = array<i64: 8, 16>}, {pipeline_mode = #tpu.pipeline_mode<synchronous>, transform_indices = @transform_1, window_bounds = array<i64: 16, 32>}, {pipeline_mode = #tpu.pipeline_mode<synchronous>, transform_indices = @transform_2, window_bounds = array<i64: 1, 32>}, {pipeline_mode = #tpu.pipeline_mode<synchronous>, transform_indices = @transform_3, window_bounds = array<i64: 32, 32>}, {pipeline_mode = #tpu.pipeline_mode<synchronous>, transform_indices = @transform_4, window_bounds = array<i64: 1, 32>}, {pipeline_mode = #tpu.pipeline_mode<synchronous>, transform_indices = @transform_5, window_bounds = array<i64: 32, 16>}, {pipeline_mode = #tpu.pipeline_mode<synchronous>, transform_indices = @transform_6, window_bounds = array<i64: 1, 16>}, {transform_indices = @transform_7, window_bounds = array<i64: 8, 8>}, {transform_indices = @transform_8, window_bounds = array<i64: 8, 9>}]} {
    %c0 = arith.constant 0 : index
    %c0_0 = arith.constant 0 : index
    %0 = vector.load %arg1[%c0, %c0_0] : memref<8x16xf32, #tpu.memory_space<vmem>>, vector<8x16xf32>
    %1 = arith.truncf %0 : vector<8x16xf32> to vector<8x16xbf16>
    %c0_1 = arith.constant 0 : index
    %c0_2 = arith.constant 0 : index
    %2 = vector.load %arg2[%c0_1, %c0_2] : memref<16x32xbf16, #tpu.memory_space<vmem>>, vector<16x32xbf16>
    %cst = arith.constant dense<0.000000e+00> : vector<8x32xf32>
    %3 = tpu.matmul %1, %2, %cst {dimension_numbers = #tpu.dot_dimension_numbers<[1], [0], [0], [1], [0, 0, 1, 1], [], []>} : vector<8x16xbf16>, vector<16x32xbf16>, vector<8x32xf32> -> vector<8x32xf32>
    %c0_3 = arith.constant 0 : index
    %c0_4 = arith.constant 0 : index
    %4 = vector.load %arg3[%c0_3, %c0_4] : memref<1x32xf32, #tpu.memory_space<vmem>>, vector<1x32xf32>
    %5 = vector.broadcast %4 : vector<1x32xf32> to vector<8x32xf32>
    %6 = arith.addf %3, %5 : vector<8x32xf32>
    %cst_5 = arith.constant 0.000000e+00 : f32
    %7 = vector.broadcast %cst_5 : f32 to vector<8x32xf32>
    %8 = arith.maximumf %6, %7 : vector<8x32xf32>
    %9 = arith.truncf %8 : vector<8x32xf32> to vector<8x32xbf16>
    %c0_6 = arith.constant 0 : index
    %c0_7 = arith.constant 0 : index
    %10 = vector.load %arg4[%c0_6, %c0_7] : memref<32x32xbf16, #tpu.memory_space<vmem>>, vector<32x32xbf16>
    %cst_8 = arith.constant dense<0.000000e+00> : vector<8x32xf32>
    %11 = tpu.matmul %9, %10, %cst_8 {dimension_numbers = #tpu.dot_dimension_numbers<[1], [0], [0], [1], [0, 0, 1, 1], [], []>} : vector<8x32xbf16>, vector<32x32xbf16>, vector<8x32xf32> -> vector<8x32xf32>
    %c0_9 = arith.constant 0 : index
    %c0_10 = arith.constant 0 : index
    %12 = vector.load %arg5[%c0_9, %c0_10] : memref<1x32xf32, #tpu.memory_space<vmem>>, vector<1x32xf32>
    %13 = vector.broadcast %12 : vector<1x32xf32> to vector<8x32xf32>
    %14 = arith.addf %11, %13 : vector<8x32xf32>
    %cst_11 = arith.constant 0.000000e+00 : f32
    %15 = vector.broadcast %cst_11 : f32 to vector<8x32xf32>
    %16 = arith.maximumf %14, %15 : vector<8x32xf32>
    %17 = arith.truncf %16 : vector<8x32xf32> to vector<8x32xbf16>
    %c0_12 = arith.constant 0 : index
    %c0_13 = arith.constant 0 : index
    %18 = vector.load %arg6[%c0_12, %c0_13] : memref<32x16xbf16, #tpu.memory_space<vmem>>, vector<32x16xbf16>
    %cst_14 = arith.constant dense<0.000000e+00> : vector<8x16xf32>
    %19 = tpu.matmul %17, %18, %cst_14 {dimension_numbers = #tpu.dot_dimension_numbers<[1], [0], [0], [1], [0, 0, 1, 1], [], []>} : vector<8x32xbf16>, vector<32x16xbf16>, vector<8x16xf32> -> vector<8x16xf32>
    %c0_15 = arith.constant 0 : index
    %c0_16 = arith.constant 0 : index
    %20 = vector.load %arg7[%c0_15, %c0_16] : memref<1x16xf32, #tpu.memory_space<vmem>>, vector<1x16xf32>
    %21 = vector.broadcast %20 : vector<1x16xf32> to vector<8x16xf32>
    %22 = arith.addf %19, %21 : vector<8x16xf32>
    %23 = vector.extract_strided_slice %22 {offsets = [0, 0], sizes = [8, 8], strides = [1, 1]} : vector<8x16xf32> to vector<8x8xf32>
    %24 = vector.extract_strided_slice %22 {offsets = [0, 8], sizes = [8, 8], strides = [1, 1]} : vector<8x16xf32> to vector<8x8xf32>
    %cst_17 = arith.constant -2.000000e+01 : f32
    %cst_18 = arith.constant 2.000000e+00 : f32
    %25 = vector.broadcast %cst_17 : f32 to vector<8x8xf32>
    %26 = arith.maximumf %25, %24 : vector<8x8xf32>
    %27 = vector.broadcast %cst_18 : f32 to vector<8x8xf32>
    %28 = arith.minimumf %27, %26 : vector<8x8xf32>
    %29 = math.exp %28 : vector<8x8xf32>
    %c0_19 = arith.constant 0 : index
    %c0_20 = arith.constant 0 : index
    %30 = vector.load %arg8[%c0_19, %c0_20] : memref<8x8xf32, #tpu.memory_space<vmem>>, vector<8x8xf32>
    %31 = arith.mulf %29, %30 : vector<8x8xf32>
    %32 = arith.addf %23, %31 : vector<8x8xf32>
    %cst_21 = arith.constant -5.000000e-01 : f32
    %33 = vector.broadcast %cst_21 : f32 to vector<8x8xf32>
    %34 = arith.mulf %33, %30 : vector<8x8xf32>
    %35 = arith.mulf %34, %30 : vector<8x8xf32>
    %36 = arith.subf %35, %28 : vector<8x8xf32>
    %cst_22 = arith.constant 0.918938517 : f32
    %37 = vector.broadcast %cst_22 : f32 to vector<8x8xf32>
    %38 = arith.subf %36, %37 : vector<8x8xf32>
    %39 = math.tanh %32 : vector<8x8xf32>
    %cst_23 = arith.constant -2.000000e+00 : f32
    %40 = vector.broadcast %cst_23 : f32 to vector<8x8xf32>
    %41 = arith.mulf %40, %32 : vector<8x8xf32>
    %cst_24 = arith.constant 0.000000e+00 : f32
    %42 = vector.broadcast %cst_24 : f32 to vector<8x8xf32>
    %43 = arith.maximumf %41, %42 : vector<8x8xf32>
    %44 = math.absf %41 : vector<8x8xf32>
    %cst_25 = arith.constant 0.000000e+00 : f32
    %45 = vector.broadcast %cst_25 : f32 to vector<8x8xf32>
    %46 = arith.subf %45, %44 : vector<8x8xf32>
    %47 = math.exp %46 : vector<8x8xf32>
    %48 = math.log1p %47 : vector<8x8xf32>
    %49 = arith.addf %43, %48 : vector<8x8xf32>
    %cst_26 = arith.constant 0.693147182 : f32
    %50 = vector.broadcast %cst_26 : f32 to vector<8x8xf32>
    %51 = arith.subf %50, %32 : vector<8x8xf32>
    %52 = arith.subf %51, %49 : vector<8x8xf32>
    %cst_27 = arith.constant 2.000000e+00 : f32
    %53 = vector.broadcast %cst_27 : f32 to vector<8x8xf32>
    %54 = arith.mulf %53, %52 : vector<8x8xf32>
    %55 = arith.subf %38, %54 : vector<8x8xf32>
    %cst_28 = arith.constant dense<0.000000e+00> : vector<8xf32>
    %56 = vector.multi_reduction <add>, %55, %cst_28 [1] : vector<8x8xf32> to vector<8xf32>
    %57 = vector.shape_cast %56 : vector<8xf32> to vector<8x1xf32>
    %c0_29 = arith.constant 0 : index
    %c0_30 = arith.constant 0 : index
    %58 = vector.load %arg9[%c0_29, %c0_30] : memref<8x9xf32, #tpu.memory_space<vmem>>, vector<8x8xf32>
    tpu.vector_store %arg9[%c0_29, %c0_30], %39 {strides = array<i32>} : memref<8x9xf32, #tpu.memory_space<vmem>>, vector<8x8xf32>,
    %c0_31 = arith.constant 0 : index
    %c8 = arith.constant 8 : index
    %59 = vector.load %arg9[%c0_31, %c8] : memref<8x9xf32, #tpu.memory_space<vmem>>, vector<8x1xf32>
    tpu.vector_store %arg9[%c0_31, %c8], %57 {strides = array<i32>} : memref<8x9xf32, #tpu.memory_space<vmem>>, vector<8x1xf32>,
    return
  }
  func.func @transform_0(%arg0: i32) -> (i32, i32) {
    %c0_i32 = arith.constant 0 : i32
    %c0_i32_0 = arith.constant 0 : i32
    return %arg0, %c0_i32 : i32, i32
  }
  func.func @transform_1(%arg0: i32) -> (i32, i32) {
    %c0_i32 = arith.constant 0 : i32
    %c0_i32_0 = arith.constant 0 : i32
    %c0_i32_1 = arith.constant 0 : i32
    return %c0_i32, %c0_i32_0 : i32, i32
  }
  func.func @transform_2(%arg0: i32) -> (i32, i32) {
    %c0_i32 = arith.constant 0 : i32
    %c0_i32_0 = arith.constant 0 : i32
    %c0_i32_1 = arith.constant 0 : i32
    return %c0_i32, %c0_i32_0 : i32, i32
  }
  func.func @transform_3(%arg0: i32) -> (i32, i32) {
    %c0_i32 = arith.constant 0 : i32
    %c0_i32_0 = arith.constant 0 : i32
    %c0_i32_1 = arith.constant 0 : i32
    return %c0_i32, %c0_i32_0 : i32, i32
  }
  func.func @transform_4(%arg0: i32) -> (i32, i32) {
    %c0_i32 = arith.constant 0 : i32
    %c0_i32_0 = arith.constant 0 : i32
    %c0_i32_1 = arith.constant 0 : i32
    return %c0_i32, %c0_i32_0 : i32, i32
  }
  func.func @transform_5(%arg0: i32) -> (i32, i32) {
    %c0_i32 = arith.constant 0 : i32
    %c0_i32_0 = arith.constant 0 : i32
    %c0_i32_1 = arith.constant 0 : i32
    return %c0_i32, %c0_i32_0 : i32, i32
  }
  func.func @transform_6(%arg0: i32) -> (i32, i32) {
    %c0_i32 = arith.constant 0 : i32
    %c0_i32_0 = arith.constant 0 : i32
    %c0_i32_1 = arith.constant 0 : i32
    return %c0_i32, %c0_i32_0 : i32, i32
  }
  func.func @transform_7(%arg0: i32) -> (i32, i32) {
    %c0_i32 = arith.constant 0 : i32
    %c0_i32_0 = arith.constant 0 : i32
    return %arg0, %c0_i32 : i32, i32
  }
  func.func @transform_8(%arg0: i32) -> (i32, i32) {
    %c0_i32 = arith.constant 0 : i32
    %c0_i32_0 = arith.constant 0 : i32
    return %arg0, %c0_i32 : i32, i32
  }
}

</mosaic_0001>

<bundles_post_ra>
// kernel: tpu_custom_call.1
= control target key start
LH: loop header
LB: loop body
LE: loop exit
PB: predicated region body
PF: predicated region fallthrough
CT: control target
= control target key end

     0   :  { %13 = vsyncpa [#allocation3], 0  ;;  %s452_s0 = inlined_call_operand.vmem [shape: f32[8,16], index: 0, kind: input, shape index: {}]   ;;  %s453_s1 = inlined_call_operand.hbm [shape: bf16[16,32], index: 1, kind: input, shape index: {}]   ;;  %s454_s2 = inlined_call_operand.vmem [shape: f32[1,32], index: 2, kind: input, shape index: {}]   ;;  %s455_s3 = inlined_call_operand.vmem [shape: bf16[32,32], index: 3, kind: input, shape index: {}]   ;;  %s456_s4 = inlined_call_operand.vmem [shape: f32[1,32], index: 4, kind: input, shape index: {}]   ;;  %s457_s5 = inlined_call_operand.vmem [shape: bf16[32,16], index: 5, kind: input, shape index: {}]   ;;  %s458_s6 = inlined_call_operand.vmem [shape: f32[1,16], index: 6, kind: input, shape index: {}]   ;;  %s459_s7 = inlined_call_operand.hbm [shape: f32[8,8], index: 7, kind: input, shape index: {}]   ;;  %s460_s8 = inlined_call_operand.hbm [shape: f32[8,9], index: 8, kind: output, shape index: {}]  }
   0x1   :  { %14 = vsyncpa [#allocation6], 0 }
   0x2   :  { %15 = vsyncpa [#allocation4], 0  ;;  %s22_s29 = sshll.u32 %s453_s1, 4  ;;  %s363_s30 = smov [#allocation2]   ;;  %s23_s29 = int_to_ptr.hbm [resolvable:$true] %s22_s29 }
   0x3   :  { %s24_s9 = sshll.u32 %s363_s30, 4  ;;  %s46_s12 = sshll.u32 %s459_s7, 4  ;;  %s25_s9 = int_to_ptr.vmem [resolvable:$true] %s24_s9  ;;  %s47_s12 = int_to_ptr.hbm [resolvable:$true] %s46_s12 }
   0x4   :  { %s364_s13 = smov 64   ;;  %s365_s14 = smov 4  }
   0x5   :  { %30 = dma.hbm_to_vmem [thread:$0]  %s23_s29, 128, %s25_s9, [#allocation3], %s364_s13, %s364_s13, %s365_s14  }
   0x6   :  { %s366_s15 = smov [#allocation5]  }
   0x7   :  { %s48_s16 = sshll.u32 %s366_s15, 4  ;;  %s49_s16 = int_to_ptr.vmem [resolvable:$true] %s48_s16 }
   0x8   :  { %51 = dma.hbm_to_vmem [thread:$0]  %s47_s12, 128, %s49_s16, [#allocation6]  }
   0x9   :  { %357 = dma.done.wait [#allocation3], 128  }
   0xa   :  { %358 = vsyncadd [#allocation3], 4294967168 }
   0xb   :  { %359 = dma.done.wait [#allocation6], 128  }
   0xc   :  { %360 = vsyncadd [#allocation6], 4294967168  ;;  %v262_v0 = vld [vmem:[#allocation2] sm:$0xff]  ;;  %vm75_vm0 = vcmask 130048   ;;  %v264_v3 = vld [vmem:[%s455_s3 + $0x8] sm:$0xff]  ;;  %vm114_vm1 = vcmask 261120  }
   0xd   :  { %v61_v1 = vld [vmem:[%s452_s0] sm:$0xff]  ;;  %86 = vmatpush.bf16.msra.mxu0 %v262_v0  ;;  %124 = vmatpush.bf16.msra.mxu1 %v264_v3  ;;  %v266_v11 = vld [vmem:[%s457_s5 + $0x8] sm:$0xff]  ;;  %vm213_vm2 = vcmask 64512   ;;  %s227_s9 = sshll.u32 %s460_s8, 4  ;;  %vm218_vm4 = vcmask 72768   ;;  %s228_s9 = int_to_ptr.hbm [resolvable:$true] %s227_s9 }
   0xe   :  { %v62_v2 = vpack.c.bf16 %v61_v1, %v61_v1  ;;  %v263_v4 = vld [vmem:[%s455_s3] sm:$0xff]  ;;  %162 = vmatpush.bf16.msra.mxu2 %v266_v11  ;;  %v173_v13 = vld [vmem:[#allocation5] sm:$0xff] }
   0xf   :  { %v274_v5 = vld [vmem:[%s454_s2] ss:$0 sm:$0xff]  ;;  %s367_s2 = smov 8   ;;  %v184_v40 = vmul.f32 -0.5, %v173_v13 }
  0x10   :  { %242 = vmatmul.msk.bf16.vlgmr.msra.gmra.mxu0 %vm75_vm0, %v62_v2  ;;  %v265_v12 = vld [vmem:[%s457_s5] sm:$0xff]  ;;  %175 = vrot.lane.b32.xlu0 %v173_v13, %s367_s2  ;;  %s368_s5 = smov 120  }
  0x11   :  { %125 = vmatpush.bf16.msra.mxu1 %v263_v4  ;;  %v275_v14 = vld [vmem:[%s456_s4] ss:$0 sm:$0xff]  ;;  %v185_v44 = vmul.f32 %v184_v40, %v173_v13  ;;  %s369_s4 = smov [#allocation7]  }
  0x12   :  { %163 = vmatpush.bf16.msra.mxu2 %v265_v12  ;;  %v276_v20 = vld [vmem:[%s458_s6] ss:$0 sm:$0xff]  ;;  %s225_s6 = sshll.u32 %s369_s4, 4  ;;  %s226_s6 = int_to_ptr.vmem [resolvable:$true] %s225_s6 }
  0x82   :  { %v176_v27 = vpop.permute.xlu0 %175 }
  0x8d   :  { %v88_v6 = vpop.f32.mrf.mxu0 }
  0x8e   :  { %v89_v7 = vadd.f32 %v274_v5, %v88_v6 }
  0x90   :  { %v92_v8 = vmax.f32 %v89_v7, 0.0 }
  0x92   :  { %v93_v9 = vpack.c.bf16 %v92_v8, %v92_v8 }
  0x94   :  { %251 = vmatmul.msk.bf16.vlgmr.msra.gmra.mxu1 %vm114_vm1, %v93_v9 }
  0x95   :  { %v90_v10 = vpop.f32.mrf.mxu0 }
 0x111   :  { %v127_v15 = vpop.f32.mrf.mxu1 }
 0x112   :  { %v128_v16 = vadd.f32 %v275_v14, %v127_v15 }
 0x114   :  { %v131_v17 = vmax.f32 %v128_v16, 0.0 }
 0x116   :  { %v132_v18 = vpack.c.bf16 %v131_v17, %v131_v17 }
 0x118   :  { %260 = vmatmul.msk.bf16.vlgmr.msra.gmra.mxu2 %vm114_vm1, %v132_v18 }
 0x119   :  { %v129_v19 = vpop.f32.mrf.mxu1 }
 0x19b   :  { %v165_v21 = vpop.f32.mrf.mxu2 }
 0x19c   :  { %v166_v22 = vadd.f32 %v276_v20, %v165_v21 }
 0x19e   :  { %v169_v23 = vmax.f32 %v166_v22, -20.0 }
 0x1a0   :  { %v170_v24 = vmin.f32 %v169_v23, 2.0 }
 0x1a2   :  { %187 = vrot.lane.b32.xlu1 %v170_v24, %s368_s5  ;;  %v171_v25 = vmul.f32 1.442695, %v170_v24 }
 0x1a3   :  { %v167_v26 = vpop.f32.mrf.mxu2 }
 0x1a4   :  { %277 = vpow2.f32 %v171_v25 }
 0x1aa   :  { %v278_v28 = vpop.eup %277 }
 0x1ab   :  { %v178_v29 = vmul.f32 %v278_v28, %v176_v27 }
 0x1ad   :  { %180 = vrot.lane.b32.xlu0 %v178_v29, %s368_s5 }
 0x214   :  { %v188_v45 = vpop.permute.xlu1 %187 }
 0x215   :  { %v190_v50 = vsub.f32 %v185_v44, %v188_v45 }
 0x217   :  { %v261_v54 = vadd.f32 -0.9189385, %v190_v50 }
 0x21f   :  { %v181_v30 = vpop.permute.xlu0 %180 }
 0x220   :  { %v183_v31 = vadd.f32 %v181_v30, %v166_v22 }
 0x222   :  { %279 = vtanh.f32 %v183_v31  ;;  %v193_v32 = vmul.f32 -2.0, %v183_v31  ;;  %v209_v51 = vsub.f32 0.6931472, %v183_v31 }
 0x224   :  { %v195_v33 = vand.u32 2147483647, %v193_v32  ;;  %v194_v48 = vmax.f32 %v193_v32, 0.0 }
 0x226   :  { %v196_v34 = vsub.f32 0.0, %v195_v33 }
 0x228   :  { %v280_v35 = vpop.eup %279  ;;  %v197_v36 = vmul.f32 1.442695, %v196_v34 }
 0x229   :  { %217 = vst.msk [vmem:[#allocation7] sm:$0xff] %vm213_vm2, %v280_v35 }
 0x22a   :  { %281 = vpow2.f32 %v197_v36 }
 0x230   :  { %v282_v37 = vpop.eup %281 }
 0x231   :  { %v199_v38 = vadd.f32 1.0, %v282_v37  ;;  %v202_v39 = vmul.f32 -0.5, %v282_v37  ;;  %v205_v42 = vand.u32 2147483647, %v282_v37 }
 0x233   :  { %283 = vlog2.f32 %v199_v38  ;;  %v203_v41 = vadd.f32 1.0, %v202_v39  ;;  %vm206_vm3 = vcmp.lt.f32.partialorder %v205_v42, 0.0004427343 }
 0x235   :  { %v204_v47 = vmul.f32 %v282_v37, %v203_v41 }
 0x239   :  { %v284_v43 = vpop.eup %283 }
 0x23a   :  { %v201_v46 = vmul.f32 0.6931472, %v284_v43 }
 0x23c   :  { %v207_v49 = vsel %vm206_vm3, %v204_v47, %v201_v46 }
 0x23d   :  { %v208_v52 = vadd.f32 %v207_v49, %v194_v48 }
 0x23f   :  { %v210_v53 = vsub.f32 %v209_v51, %v208_v52 }
 0x241   :  { %v211_v55 = vmul.f32 2.0, %v210_v53 }
 0x243   :  { %v212_v56 = vsub.f32 %v261_v54, %v211_v55 }
 0x245   :  { %v214_v57 = vsel %vm213_vm2, %v212_v56, 0.0 }
 0x246   :  { %215 = vadd.xlane.f32.xlu1 %v214_v57 }
 0x2b9   :  { %v216_v58 = vpop.xlane.xlu1 %215 }
 0x2ba   :  { %219 = vst.msk [vmem:[#allocation7] sm:$0xff] %vm218_vm4, %v216_v58 }
 0x2bb   :  { %230 = dma.vmem_to_hbm [thread:$0]  %s226_s6, 128, %s228_s9, [#allocation4]  }
 0x2bc   :  { %361 = dma.done.wait [#allocation4], 128  }
 0x2bd   :  { %362 = vsyncadd [#allocation4], 4294967168 }
 0x2be   :  { %235 = vsyncpa [#allocation3], 1 }
 0x2bf   :  { %236 = vsyncpa [#allocation6], 1 }
 0x2c0   :  { %237 = vsyncpa [#allocation4], 1 }

</bundles_post_ra>
